<compile_context>
chip_gen: v7x
topology: tpu7x:2x2x1
jax: 0.10.0
libtpu: 0.0.40
codegen_flags: <defaults>
</compile_context>

<pallas_src>
import functools

import numpy as np
import jax
import jax.numpy as jnp
from jax import lax
from jax.experimental import pallas as pl
from jax.experimental.pallas import tpu as pltpu


# ---------------------------------------------------------------------------
# One-time (init-time, host-side) branch fusion.  Never executed per forward.
# The module crops every branch to the minimum spatial extent, which here is the
# 3x3 branch's valid-conv window; under that symmetric crop the 1x1 conv is
# exactly a valid 3x3 conv whose only nonzero tap is the center.
# ---------------------------------------------------------------------------
def make_concat_params(w0, b0, w1, b1):
    w0 = np.asarray(w0); b0 = np.asarray(b0)
    w1 = np.asarray(w1); b1 = np.asarray(b1)
    C0, Cin = w0.shape[0], w0.shape[1]
    C1, _, kh, kw = w1.shape
    # Center-tap fusion is exact only for odd kernels / symmetric crops.
    assert kh % 2 == 1 and kw % 2 == 1, "center-tap fusion needs an odd-sized kernel"

    w0_as_3x3 = np.zeros((C0, Cin, kh, kw), w0.dtype)
    w0_as_3x3[:, :, kh // 2, kw // 2] = w0[:, :, 0, 0]
    w_full = np.concatenate([w0_as_3x3, w1], axis=0)              # (Ctot, Cin, kh, kw)
    # tap-major layout: w_taps[i*kw + j] == w_full[:, :, i, j]  -> (kh*kw, Ctot, Cin)
    w_taps = np.transpose(w_full, (2, 3, 0, 1)).reshape(kh * kw, C0 + C1, Cin)
    bias = np.concatenate([b0, b1]).reshape(C0 + C1, 1)           # (Ctot, 1)
    return jnp.asarray(w_taps), jnp.asarray(bias), kh, kw


# ---------------------------------------------------------------------------
# Single-step fused kernel:
#   for each batch element: out[c, p] = sum_{t=(i,j)} (W_t @ roll(x, i*W+j))[c, p] + b[c]
# computed on the full 16x16 = 256-lane flattened spatial grid; positions with
# h >= Ho or w >= Wo are garbage (row wrap) and are cropped by the wrapper slice.
# ---------------------------------------------------------------------------
@functools.partial(jax.jit, static_argnames=("kh", "kw"))
def concat_forward(x, w_taps, bias, *, kh, kw):
    N, Cin, H, W = x.shape
    KK, Ctot, _ = w_taps.shape
    HW = H * W
    Ho, Wo = H - kh + 1, W - kw + 1          # module's crop target (3x3 branch extent)

    x_flat = x.reshape(N, Cin, HW)           # contiguous (free) reshape

    def kernel(x_ref, w_ref, b_ref, o_ref):
        # x_ref: (N, Cin, HW)   raw input, spatial flattened onto 256 lanes
        # w_ref: (kh*kw, Ctot, Cin) fused per-tap weights (1x1 branch = center tap)
        # b_ref: (Ctot, 1)      concatenated biases
        # o_ref: (N, Ctot, HW)  conv over the full HxW grid (wrapper crops to Ho x Wo)
        bias_v = b_ref[...]                                  # (Ctot, 1)
        for n in range(N):                                   # N=2, static unroll
            x_n = x_ref[n]                                   # (Cin, HW) = (4, 256)
            acc = None
            for i in range(kh):
                for j in range(kw):
                    off = i * W + j
                    # Bring x[:, h+i, w+j] onto lane h*W + w (jnp.roll semantics:
                    # shift = -off mod HW).  XLU lane rotate — free next to the MXU.
                    tap = x_n if off == 0 else pltpu.roll(x_n, shift=HW - off, axis=1)
                    d = jnp.dot(w_ref[i * kw + j], tap,
                                preferred_element_type=jnp.float32)   # (Ctot, HW)
                    acc = d if acc is None else acc + d
            o_ref[n] = (acc + bias_v).astype(o_ref.dtype)    # VPU bias add, dense store

    out_flat = pl.pallas_call(
        kernel,
        out_shape=jax.ShapeDtypeStruct((N, Ctot, HW), jnp.float32),
        grid_spec=pltpu.PrefetchScalarGridSpec(
            num_scalar_prefetch=0,
            grid=(1,),                                   # single step: whole problem < 40 KB
            in_specs=[
                pl.BlockSpec((N, Cin, HW), lambda g: (0, 0, 0)),
                pl.BlockSpec((KK, Ctot, Cin), lambda g: (0, 0, 0)),
                pl.BlockSpec((Ctot, 1), lambda g: (0, 0)),
            ],
            out_specs=pl.BlockSpec((N, Ctot, HW), lambda g: (0, 0, 0)),
        ),
        compiler_params=pltpu.CompilerParams(
            dimension_semantics=("arbitrary",),
        ),
    )(x_flat, w_taps, bias)

    # (N, Ctot, H*W) -> NCHW is a contiguous reshape; crop to the module's target
    # window (top-left Ho x Wo of the computed grid) is a single wrapper slice.
    # TODO(synk): the final non-contiguous crop stays in XLA; doing it in-kernel would
    # reintroduce 14-wide masked stores for no benefit at this size.
    return out_flat.reshape(N, Ctot, H, W)[:, :, :Ho, :Wo]


# ---------------------------------------------------------------------------
# Pure-JAX reference of the same forward (Concat semantics), for a sanity check.
# ---------------------------------------------------------------------------
def _reference(x, w0, b0, w1, b1):
    def conv(x, w, b):
        y = lax.conv_general_dilated(
            x, w, window_strides=(1, 1), padding="VALID",
            dimension_numbers=("NCHW", "OIHW", "NCHW"))
        return y + b.reshape(1, -1, 1, 1)
    y0 = conv(x, w0, b0)
    y1 = conv(x, w1, b1)
    Ht = min(y0.shape[2], y1.shape[2])
    Wt = min(y0.shape[3], y1.shape[3])
    def crop(y):
        d2 = (y.shape[2] - Ht) // 2
        d3 = (y.shape[3] - Wt) // 2
        return y[:, :, d2:d2 + Ht, d3:d3 + Wt]
    return jnp.concatenate([crop(y0), crop(y1)], axis=1)


if __name__ == "__main__":
    key = jax.random.PRNGKey(0)
    kx, k0w, k0b, k1w, k1b = jax.random.split(key, 5)

    N, Cin, H, W = 2, 4, 16, 16
    Cout = 6

    x = jax.random.normal(kx, (N, Cin, H, W), dtype=jnp.float32)
    w0 = jax.random.normal(k0w, (Cout, Cin, 1, 1), dtype=jnp.float32) * 0.1
    b0 = jax.random.normal(k0b, (Cout,), dtype=jnp.float32) * 0.1
    w1 = jax.random.normal(k1w, (Cout, Cin, 3, 3), dtype=jnp.float32) * 0.1
    b1 = jax.random.normal(k1b, (Cout,), dtype=jnp.float32) * 0.1

    # Init-time (one-off) branch fusion — not part of the per-call forward path.
    w_taps, bias, kh, kw = make_concat_params(w0, b0, w1, b1)

    out = concat_forward(x, w_taps, bias, kh=kh, kw=kw)
    out = jax.block_until_ready(out)

    ref = _reference(x, w0, b0, w1, b1)
    assert out.shape == (N, 2 * Cout, H - kh + 1, W - kw + 1), out.shape
    assert jnp.allclose(out, ref, atol=1e-4, rtol=1e-4), "mismatch vs reference"

    print("KERNEL_OK")
</pallas_src>

<mosaic_0001>
module attributes {stable_mosaic.version = 11 : i64} {
  func.func @kernel(%arg0: i32, %arg1: memref<2x4x256xf32, #tpu.memory_space<vmem>>, %arg2: memref<9x12x4xf32, #tpu.memory_space<vmem>>, %arg3: memref<12x1xf32, #tpu.memory_space<vmem>>, %arg4: memref<2x12x256xf32, #tpu.memory_space<vmem>>) attributes {dimension_semantics = [#tpu.dimension_semantics<arbitrary>], iteration_bounds = array<i64: 1>, scalar_prefetch = 0 : i64, scratch_operands = 0 : i64, tpu.core_type = #tpu.core_type<tc>, window_params = [{pipeline_mode = #tpu.pipeline_mode<synchronous>, transform_indices = @transform_0, window_bounds = array<i64: 2, 4, 256>}, {pipeline_mode = #tpu.pipeline_mode<synchronous>, transform_indices = @transform_1, window_bounds = array<i64: 9, 12, 4>}, {pipeline_mode = #tpu.pipeline_mode<synchronous>, transform_indices = @transform_2, window_bounds = array<i64: 12, 1>}, {pipeline_mode = #tpu.pipeline_mode<synchronous>, transform_indices = @transform_3, window_bounds = array<i64: 2, 12, 256>}]} {
    %c0 = arith.constant 0 : index
    %c0_0 = arith.constant 0 : index
    %0 = vector.load %arg3[%c0, %c0_0] : memref<12x1xf32, #tpu.memory_space<vmem>>, vector<12x1xf32>
    %c0_1 = arith.constant 0 : index
    %c0_2 = arith.constant 0 : index
    %c0_3 = arith.constant 0 : index
    %1 = vector.load %arg1[%c0_1, %c0_2, %c0_3] : memref<2x4x256xf32, #tpu.memory_space<vmem>>, vector<1x4x256xf32>
    %2 = vector.shape_cast %1 : vector<1x4x256xf32> to vector<4x256xf32>
    %c0_4 = arith.constant 0 : index
    %c0_5 = arith.constant 0 : index
    %c0_6 = arith.constant 0 : index
    %3 = vector.load %arg2[%c0_4, %c0_5, %c0_6] : memref<9x12x4xf32, #tpu.memory_space<vmem>>, vector<1x12x4xf32>
    %4 = vector.shape_cast %3 : vector<1x12x4xf32> to vector<12x4xf32>
    %cst = arith.constant dense<0.000000e+00> : vector<12x256xf32>
    %5 = tpu.matmul %4, %2, %cst {dimension_numbers = #tpu.dot_dimension_numbers<[1], [0], [0], [1], [0, 0, 1, 1], [], []>} : vector<12x4xf32>, vector<4x256xf32>, vector<12x256xf32> -> vector<12x256xf32>
    %c255_i32 = arith.constant 255 : i32
    %6 = tpu.dynamic_rotate %2 by %c255_i32 dim 1 : vector<4x256xf32>, i32 -> vector<4x256xf32>
    %c1 = arith.constant 1 : index
    %c0_7 = arith.constant 0 : index
    %c0_8 = arith.constant 0 : index
    %7 = vector.load %arg2[%c1, %c0_7, %c0_8] : memref<9x12x4xf32, #tpu.memory_space<vmem>>, vector<1x12x4xf32>
    %8 = vector.shape_cast %7 : vector<1x12x4xf32> to vector<12x4xf32>
    %cst_9 = arith.constant dense<0.000000e+00> : vector<12x256xf32>
    %9 = tpu.matmul %8, %6, %cst_9 {dimension_numbers = #tpu.dot_dimension_numbers<[1], [0], [0], [1], [0, 0, 1, 1], [], []>} : vector<12x4xf32>, vector<4x256xf32>, vector<12x256xf32> -> vector<12x256xf32>
    %10 = arith.addf %5, %9 : vector<12x256xf32>
    %c254_i32 = arith.constant 254 : i32
    %11 = tpu.dynamic_rotate %2 by %c254_i32 dim 1 : vector<4x256xf32>, i32 -> vector<4x256xf32>
    %c2 = arith.constant 2 : index
    %c0_10 = arith.constant 0 : index
    %c0_11 = arith.constant 0 : index
    %12 = vector.load %arg2[%c2, %c0_10, %c0_11] : memref<9x12x4xf32, #tpu.memory_space<vmem>>, vector<1x12x4xf32>
    %13 = vector.shape_cast %12 : vector<1x12x4xf32> to vector<12x4xf32>
    %cst_12 = arith.constant dense<0.000000e+00> : vector<12x256xf32>
    %14 = tpu.matmul %13, %11, %cst_12 {dimension_numbers = #tpu.dot_dimension_numbers<[1], [0], [0], [1], [0, 0, 1, 1], [], []>} : vector<12x4xf32>, vector<4x256xf32>, vector<12x256xf32> -> vector<12x256xf32>
    %15 = arith.addf %10, %14 : vector<12x256xf32>
    %c240_i32 = arith.constant 240 : i32
    %16 = tpu.dynamic_rotate %2 by %c240_i32 dim 1 : vector<4x256xf32>, i32 -> vector<4x256xf32>
    %c3 = arith.constant 3 : index
    %c0_13 = arith.constant 0 : index
    %c0_14 = arith.constant 0 : index
    %17 = vector.load %arg2[%c3, %c0_13, %c0_14] : memref<9x12x4xf32, #tpu.memory_space<vmem>>, vector<1x12x4xf32>
    %18 = vector.shape_cast %17 : vector<1x12x4xf32> to vector<12x4xf32>
    %cst_15 = arith.constant dense<0.000000e+00> : vector<12x256xf32>
    %19 = tpu.matmul %18, %16, %cst_15 {dimension_numbers = #tpu.dot_dimension_numbers<[1], [0], [0], [1], [0, 0, 1, 1], [], []>} : vector<12x4xf32>, vector<4x256xf32>, vector<12x256xf32> -> vector<12x256xf32>
    %20 = arith.addf %15, %19 : vector<12x256xf32>
    %c239_i32 = arith.constant 239 : i32
    %21 = tpu.dynamic_rotate %2 by %c239_i32 dim 1 : vector<4x256xf32>, i32 -> vector<4x256xf32>
    %c4 = arith.constant 4 : index
    %c0_16 = arith.constant 0 : index
    %c0_17 = arith.constant 0 : index
    %22 = vector.load %arg2[%c4, %c0_16, %c0_17] : memref<9x12x4xf32, #tpu.memory_space<vmem>>, vector<1x12x4xf32>
    %23 = vector.shape_cast %22 : vector<1x12x4xf32> to vector<12x4xf32>
    %cst_18 = arith.constant dense<0.000000e+00> : vector<12x256xf32>
    %24 = tpu.matmul %23, %21, %cst_18 {dimension_numbers = #tpu.dot_dimension_numbers<[1], [0], [0], [1], [0, 0, 1, 1], [], []>} : vector<12x4xf32>, vector<4x256xf32>, vector<12x256xf32> -> vector<12x256xf32>
    %25 = arith.addf %20, %24 : vector<12x256xf32>
    %c238_i32 = arith.constant 238 : i32
    %26 = tpu.dynamic_rotate %2 by %c238_i32 dim 1 : vector<4x256xf32>, i32 -> vector<4x256xf32>
    %c5 = arith.constant 5 : index
    %c0_19 = arith.constant 0 : index
    %c0_20 = arith.constant 0 : index
    %27 = vector.load %arg2[%c5, %c0_19, %c0_20] : memref<9x12x4xf32, #tpu.memory_space<vmem>>, vector<1x12x4xf32>
    %28 = vector.shape_cast %27 : vector<1x12x4xf32> to vector<12x4xf32>
    %cst_21 = arith.constant dense<0.000000e+00> : vector<12x256xf32>
    %29 = tpu.matmul %28, %26, %cst_21 {dimension_numbers = #tpu.dot_dimension_numbers<[1], [0], [0], [1], [0, 0, 1, 1], [], []>} : vector<12x4xf32>, vector<4x256xf32>, vector<12x256xf32> -> vector<12x256xf32>
    %30 = arith.addf %25, %29 : vector<12x256xf32>
    %c224_i32 = arith.constant 224 : i32
    %31 = tpu.dynamic_rotate %2 by %c224_i32 dim 1 : vector<4x256xf32>, i32 -> vector<4x256xf32>
    %c6 = arith.constant 6 : index
    %c0_22 = arith.constant 0 : index
    %c0_23 = arith.constant 0 : index
    %32 = vector.load %arg2[%c6, %c0_22, %c0_23] : memref<9x12x4xf32, #tpu.memory_space<vmem>>, vector<1x12x4xf32>
    %33 = vector.shape_cast %32 : vector<1x12x4xf32> to vector<12x4xf32>
    %cst_24 = arith.constant dense<0.000000e+00> : vector<12x256xf32>
    %34 = tpu.matmul %33, %31, %cst_24 {dimension_numbers = #tpu.dot_dimension_numbers<[1], [0], [0], [1], [0, 0, 1, 1], [], []>} : vector<12x4xf32>, vector<4x256xf32>, vector<12x256xf32> -> vector<12x256xf32>
    %35 = arith.addf %30, %34 : vector<12x256xf32>
    %c223_i32 = arith.constant 223 : i32
    %36 = tpu.dynamic_rotate %2 by %c223_i32 dim 1 : vector<4x256xf32>, i32 -> vector<4x256xf32>
    %c7 = arith.constant 7 : index
    %c0_25 = arith.constant 0 : index
    %c0_26 = arith.constant 0 : index
    %37 = vector.load %arg2[%c7, %c0_25, %c0_26] : memref<9x12x4xf32, #tpu.memory_space<vmem>>, vector<1x12x4xf32>
    %38 = vector.shape_cast %37 : vector<1x12x4xf32> to vector<12x4xf32>
    %cst_27 = arith.constant dense<0.000000e+00> : vector<12x256xf32>
    %39 = tpu.matmul %38, %36, %cst_27 {dimension_numbers = #tpu.dot_dimension_numbers<[1], [0], [0], [1], [0, 0, 1, 1], [], []>} : vector<12x4xf32>, vector<4x256xf32>, vector<12x256xf32> -> vector<12x256xf32>
    %40 = arith.addf %35, %39 : vector<12x256xf32>
    %c222_i32 = arith.constant 222 : i32
    %41 = tpu.dynamic_rotate %2 by %c222_i32 dim 1 : vector<4x256xf32>, i32 -> vector<4x256xf32>
    %c8 = arith.constant 8 : index
    %c0_28 = arith.constant 0 : index
    %c0_29 = arith.constant 0 : index
    %42 = vector.load %arg2[%c8, %c0_28, %c0_29] : memref<9x12x4xf32, #tpu.memory_space<vmem>>, vector<1x12x4xf32>
    %43 = vector.shape_cast %42 : vector<1x12x4xf32> to vector<12x4xf32>
    %cst_30 = arith.constant dense<0.000000e+00> : vector<12x256xf32>
    %44 = tpu.matmul %43, %41, %cst_30 {dimension_numbers = #tpu.dot_dimension_numbers<[1], [0], [0], [1], [0, 0, 1, 1], [], []>} : vector<12x4xf32>, vector<4x256xf32>, vector<12x256xf32> -> vector<12x256xf32>
    %45 = arith.addf %40, %44 : vector<12x256xf32>
    %46 = vector.broadcast %0 : vector<12x1xf32> to vector<12x256xf32>
    %47 = arith.addf %45, %46 : vector<12x256xf32>
    %c0_31 = arith.constant 0 : index
    %c0_32 = arith.constant 0 : index
    %c0_33 = arith.constant 0 : index
    %48 = vector.load %arg4[%c0_31, %c0_32, %c0_33] : memref<2x12x256xf32, #tpu.memory_space<vmem>>, vector<1x12x256xf32>
    %49 = vector.shape_cast %48 : vector<1x12x256xf32> to vector<12x256xf32>
    %50 = vector.shape_cast %47 : vector<12x256xf32> to vector<1x12x256xf32>
    tpu.vector_store %arg4[%c0_31, %c0_32, %c0_33], %50 {strides = array<i32>} : memref<2x12x256xf32, #tpu.memory_space<vmem>>, vector<1x12x256xf32>,
    %c1_34 = arith.constant 1 : index
    %c0_35 = arith.constant 0 : index
    %c0_36 = arith.constant 0 : index
    %51 = vector.load %arg1[%c1_34, %c0_35, %c0_36] : memref<2x4x256xf32, #tpu.memory_space<vmem>>, vector<1x4x256xf32>
    %52 = vector.shape_cast %51 : vector<1x4x256xf32> to vector<4x256xf32>
    %c0_37 = arith.constant 0 : index
    %c0_38 = arith.constant 0 : index
    %c0_39 = arith.constant 0 : index
    %53 = vector.load %arg2[%c0_37, %c0_38, %c0_39] : memref<9x12x4xf32, #tpu.memory_space<vmem>>, vector<1x12x4xf32>
    %54 = vector.shape_cast %53 : vector<1x12x4xf32> to vector<12x4xf32>
    %cst_40 = arith.constant dense<0.000000e+00> : vector<12x256xf32>
    %55 = tpu.matmul %54, %52, %cst_40 {dimension_numbers = #tpu.dot_dimension_numbers<[1], [0], [0], [1], [0, 0, 1, 1], [], []>} : vector<12x4xf32>, vector<4x256xf32>, vector<12x256xf32> -> vector<12x256xf32>
    %c255_i32_41 = arith.constant 255 : i32
    %56 = tpu.dynamic_rotate %52 by %c255_i32_41 dim 1 : vector<4x256xf32>, i32 -> vector<4x256xf32>
    %c1_42 = arith.constant 1 : index
    %c0_43 = arith.constant 0 : index
    %c0_44 = arith.constant 0 : index
    %57 = vector.load %arg2[%c1_42, %c0_43, %c0_44] : memref<9x12x4xf32, #tpu.memory_space<vmem>>, vector<1x12x4xf32>
    %58 = vector.shape_cast %57 : vector<1x12x4xf32> to vector<12x4xf32>
    %cst_45 = arith.constant dense<0.000000e+00> : vector<12x256xf32>
    %59 = tpu.matmul %58, %56, %cst_45 {dimension_numbers = #tpu.dot_dimension_numbers<[1], [0], [0], [1], [0, 0, 1, 1], [], []>} : vector<12x4xf32>, vector<4x256xf32>, vector<12x256xf32> -> vector<12x256xf32>
    %60 = arith.addf %55, %59 : vector<12x256xf32>
    %c254_i32_46 = arith.constant 254 : i32
    %61 = tpu.dynamic_rotate %52 by %c254_i32_46 dim 1 : vector<4x256xf32>, i32 -> vector<4x256xf32>
    %c2_47 = arith.constant 2 : index
    %c0_48 = arith.constant 0 : index
    %c0_49 = arith.constant 0 : index
    %62 = vector.load %arg2[%c2_47, %c0_48, %c0_49] : memref<9x12x4xf32, #tpu.memory_space<vmem>>, vector<1x12x4xf32>
    %63 = vector.shape_cast %62 : vector<1x12x4xf32> to vector<12x4xf32>
    %cst_50 = arith.constant dense<0.000000e+00> : vector<12x256xf32>
    %64 = tpu.matmul %63, %61, %cst_50 {dimension_numbers = #tpu.dot_dimension_numbers<[1], [0], [0], [1], [0, 0, 1, 1], [], []>} : vector<12x4xf32>, vector<4x256xf32>, vector<12x256xf32> -> vector<12x256xf32>
    %65 = arith.addf %60, %64 : vector<12x256xf32>
    %c240_i32_51 = arith.constant 240 : i32
    %66 = tpu.dynamic_rotate %52 by %c240_i32_51 dim 1 : vector<4x256xf32>, i32 -> vector<4x256xf32>
    %c3_52 = arith.constant 3 : index
    %c0_53 = arith.constant 0 : index
    %c0_54 = arith.constant 0 : index
    %67 = vector.load %arg2[%c3_52, %c0_53, %c0_54] : memref<9x12x4xf32, #tpu.memory_space<vmem>>, vector<1x12x4xf32>
    %68 = vector.shape_cast %67 : vector<1x12x4xf32> to vector<12x4xf32>
    %cst_55 = arith.constant dense<0.000000e+00> : vector<12x256xf32>
    %69 = tpu.matmul %68, %66, %cst_55 {dimension_numbers = #tpu.dot_dimension_numbers<[1], [0], [0], [1], [0, 0, 1, 1], [], []>} : vector<12x4xf32>, vector<4x256xf32>, vector<12x256xf32> -> vector<12x256xf32>
    %70 = arith.addf %65, %69 : vector<12x256xf32>
    %c239_i32_56 = arith.constant 239 : i32
    %71 = tpu.dynamic_rotate %52 by %c239_i32_56 dim 1 : vector<4x256xf32>, i32 -> vector<4x256xf32>
    %c4_57 = arith.constant 4 : index
    %c0_58 = arith.constant 0 : index
    %c0_59 = arith.constant 0 : index
    %72 = vector.load %arg2[%c4_57, %c0_58, %c0_59] : memref<9x12x4xf32, #tpu.memory_space<vmem>>, vector<1x12x4xf32>
    %73 = vector.shape_cast %72 : vector<1x12x4xf32> to vector<12x4xf32>
    %cst_60 = arith.constant dense<0.000000e+00> : vector<12x256xf32>
    %74 = tpu.matmul %73, %71, %cst_60 {dimension_numbers = #tpu.dot_dimension_numbers<[1], [0], [0], [1], [0, 0, 1, 1], [], []>} : vector<12x4xf32>, vector<4x256xf32>, vector<12x256xf32> -> vector<12x256xf32>
    %75 = arith.addf %70, %74 : vector<12x256xf32>
    %c238_i32_61 = arith.constant 238 : i32
    %76 = tpu.dynamic_rotate %52 by %c238_i32_61 dim 1 : vector<4x256xf32>, i32 -> vector<4x256xf32>
    %c5_62 = arith.constant 5 : index
    %c0_63 = arith.constant 0 : index
    %c0_64 = arith.constant 0 : index
    %77 = vector.load %arg2[%c5_62, %c0_63, %c0_64] : memref<9x12x4xf32, #tpu.memory_space<vmem>>, vector<1x12x4xf32>
    %78 = vector.shape_cast %77 : vector<1x12x4xf32> to vector<12x4xf32>
    %cst_65 = arith.constant dense<0.000000e+00> : vector<12x256xf32>
    %79 = tpu.matmul %78, %76, %cst_65 {dimension_numbers = #tpu.dot_dimension_numbers<[1], [0], [0], [1], [0, 0, 1, 1], [], []>} : vector<12x4xf32>, vector<4x256xf32>, vector<12x256xf32> -> vector<12x256xf32>
    %80 = arith.addf %75, %79 : vector<12x256xf32>
    %c224_i32_66 = arith.constant 224 : i32
    %81 = tpu.dynamic_rotate %52 by %c224_i32_66 dim 1 : vector<4x256xf32>, i32 -> vector<4x256xf32>
    %c6_67 = arith.constant 6 : index
    %c0_68 = arith.constant 0 : index
    %c0_69 = arith.constant 0 : index
    %82 = vector.load %arg2[%c6_67, %c0_68, %c0_69] : memref<9x12x4xf32, #tpu.memory_space<vmem>>, vector<1x12x4xf32>
    %83 = vector.shape_cast %82 : vector<1x12x4xf32> to vector<12x4xf32>
    %cst_70 = arith.constant dense<0.000000e+00> : vector<12x256xf32>
    %84 = tpu.matmul %83, %81, %cst_70 {dimension_numbers = #tpu.dot_dimension_numbers<[1], [0], [0], [1], [0, 0, 1, 1], [], []>} : vector<12x4xf32>, vector<4x256xf32>, vector<12x256xf32> -> vector<12x256xf32>
    %85 = arith.addf %80, %84 : vector<12x256xf32>
    %c223_i32_71 = arith.constant 223 : i32
    %86 = tpu.dynamic_rotate %52 by %c223_i32_71 dim 1 : vector<4x256xf32>, i32 -> vector<4x256xf32>
    %c7_72 = arith.constant 7 : index
    %c0_73 = arith.constant 0 : index
    %c0_74 = arith.constant 0 : index
    %87 = vector.load %arg2[%c7_72, %c0_73, %c0_74] : memref<9x12x4xf32, #tpu.memory_space<vmem>>, vector<1x12x4xf32>
    %88 = vector.shape_cast %87 : vector<1x12x4xf32> to vector<12x4xf32>
    %cst_75 = arith.constant dense<0.000000e+00> : vector<12x256xf32>
    %89 = tpu.matmul %88, %86, %cst_75 {dimension_numbers = #tpu.dot_dimension_numbers<[1], [0], [0], [1], [0, 0, 1, 1], [], []>} : vector<12x4xf32>, vector<4x256xf32>, vector<12x256xf32> -> vector<12x256xf32>
    %90 = arith.addf %85, %89 : vector<12x256xf32>
    %c222_i32_76 = arith.constant 222 : i32
    %91 = tpu.dynamic_rotate %52 by %c222_i32_76 dim 1 : vector<4x256xf32>, i32 -> vector<4x256xf32>
    %c8_77 = arith.constant 8 : index
    %c0_78 = arith.constant 0 : index
    %c0_79 = arith.constant 0 : index
    %92 = vector.load %arg2[%c8_77, %c0_78, %c0_79] : memref<9x12x4xf32, #tpu.memory_space<vmem>>, vector<1x12x4xf32>
    %93 = vector.shape_cast %92 : vector<1x12x4xf32> to vector<12x4xf32>
    %cst_80 = arith.constant dense<0.000000e+00> : vector<12x256xf32>
    %94 = tpu.matmul %93, %91, %cst_80 {dimension_numbers = #tpu.dot_dimension_numbers<[1], [0], [0], [1], [0, 0, 1, 1], [], []>} : vector<12x4xf32>, vector<4x256xf32>, vector<12x256xf32> -> vector<12x256xf32>
    %95 = arith.addf %90, %94 : vector<12x256xf32>
    %96 = vector.broadcast %0 : vector<12x1xf32> to vector<12x256xf32>
    %97 = arith.addf %95, %96 : vector<12x256xf32>
    %c1_81 = arith.constant 1 : index
    %c0_82 = arith.constant 0 : index
    %c0_83 = arith.constant 0 : index
    %98 = vector.load %arg4[%c1_81, %c0_82, %c0_83] : memref<2x12x256xf32, #tpu.memory_space<vmem>>, vector<1x12x256xf32>
    %99 = vector.shape_cast %98 : vector<1x12x256xf32> to vector<12x256xf32>
    %100 = vector.shape_cast %97 : vector<12x256xf32> to vector<1x12x256xf32>
    tpu.vector_store %arg4[%c1_81, %c0_82, %c0_83], %100 {strides = array<i32>} : memref<2x12x256xf32, #tpu.memory_space<vmem>>, vector<1x12x256xf32>,
    return
  }
  func.func @transform_0(%arg0: i32) -> (i32, i32, i32) {
    %c0_i32 = arith.constant 0 : i32
    %c0_i32_0 = arith.constant 0 : i32
    %c0_i32_1 = arith.constant 0 : i32
    %c0_i32_2 = arith.constant 0 : i32
    return %c0_i32, %c0_i32_0, %c0_i32_1 : i32, i32, i32
  }
  func.func @transform_1(%arg0: i32) -> (i32, i32, i32) {
    %c0_i32 = arith.constant 0 : i32
    %c0_i32_0 = arith.constant 0 : i32
    %c0_i32_1 = arith.constant 0 : i32
    %c0_i32_2 = arith.constant 0 : i32
    return %c0_i32, %c0_i32_0, %c0_i32_1 : i32, i32, i32
  }
  func.func @transform_2(%arg0: i32) -> (i32, i32) {
    %c0_i32 = arith.constant 0 : i32
    %c0_i32_0 = arith.constant 0 : i32
    %c0_i32_1 = arith.constant 0 : i32
    return %c0_i32, %c0_i32_0 : i32, i32
  }
  func.func @transform_3(%arg0: i32) -> (i32, i32, i32) {
    %c0_i32 = arith.constant 0 : i32
    %c0_i32_0 = arith.constant 0 : i32
    %c0_i32_1 = arith.constant 0 : i32
    %c0_i32_2 = arith.constant 0 : i32
    return %c0_i32, %c0_i32_0, %c0_i32_1 : i32, i32, i32
  }
}

</mosaic_0001>

<bundles_post_ra>
// kernel: concat_forward.1
= control target key start
LH: loop header
LB: loop body
LE: loop exit
PB: predicated region body
PF: predicated region fallthrough
CT: control target
= control target key end

     0   :  { %v2049_v2 = vmov 0.0   ;;  %s2050_s16 = smov 127   ;;  %s2052_s17 = smov 112   ;;  %v2058_v5 = vmov 0   ;;  %v26_v8 = vlaneseq  ;;  %vm41_vm1 = vcmask 1043456   ;;  %s2418_s0 = inlined_call_operand.vmem [shape: f32[2,4,256], index: 0, kind: input, shape index: {}]   ;;  %s2419_s2 = inlined_call_operand.vmem [shape: f32[12,1], index: 2, kind: input, shape index: {}]   ;;  %s2420_s1 = inlined_call_operand.vmem [shape: f32[9,12,4], index: 1, kind: input, shape index: {}]   ;;  %s2421_s3 = inlined_call_operand.vmem [shape: f32[2,12,256], index: 3, kind: output, shape index: {}]  }
   0x1   :  { %v2082_v0 = vld [vmem:[%s2418_s0 + $0x8] sm:$0xff]  ;;  %v2087_v1 = vld [vmem:[%s2418_s0] sm:$0xff]  ;;  %112 = vmatprep.mubr.f32.mxu0 %v2049_v2  ;;  %1042 = vmatprep.mubr.f32.mxu1 %v2049_v2  ;;  %s2051_s0 = smov 126   ;;  %s2053_s18 = smov 111   ;;  %vm34_vm2 = vcmask 31744   ;;  %v1862_v18 = vld [vmem:[%s2420_s1 + $0x10] sm:$0xff] }
   0x2   :  { %958 = vrot.lane.b32.xlu1 %v2082_v0, %s2050_s16  ;;  %22 = vrot.lane.b32.xlu0 %v2087_v1, %s2050_s16  ;;  %v2095_v3 = vcombine.high %v2082_v0, %v2082_v0  ;;  %v2099_v4 = vcombine.high %v2087_v1, %v2087_v1  ;;  %s2054_s19 = smov 110   ;;  %s2055_s20 = smov 96   ;;  %v14_v6 = vld [vmem:[%s2419_s2] sm:$0xff]  ;;  %v15_v7 = vld [vmem:[%s2419_s2 + $0x8] sm:$0xf]  ;;  %v2137_v9 = vand.u32 127, %v26_v8 }
   0x3   :  { %s2056_s21 = smov 95   ;;  %s2057_s22 = smov 94   ;;  %2045 = vset.pattern.permute.xlu0 %v2058_v5  ;;  %2046 = vset.pattern.permute.xlu1 %v2058_v5  ;;  %v1863_v22 = vld [vmem:[%s2420_s1 + $0x18] sm:$0xf]  ;;  %v17_v27 = vld [vmem:[%s2420_s1] sm:$0xff]  ;;  %v1878_v49 = vld [vmem:[%s2420_s1 + $0x30] sm:$0xff] }
   0x4   :  { %vm28_vm0 = vcmp.lt.s32.totalorder %v2137_v9, 127  ;;  %vm216_vm3 = vcmp.lt.s32.totalorder %v2137_v9, 126  ;;  %v1916_v23 = vld [vmem:[%s2420_s1 + $0x18] sm:$0xf]  ;;  %vm319_vm4 = vcmp.lt.s32.totalorder %v2137_v9, 112  ;;  %v1872_v38 = vld [vmem:[%s2420_s1 + $0x20] sm:$0xff] }
   0x5   :  { %v18_v33 = vld [vmem:[%s2420_s1 + $0x8] sm:$0xf]  ;;  %vm422_vm5 = vcmp.lt.s32.totalorder %v2137_v9, 111  ;;  %vm525_vm6 = vcmp.lt.s32.totalorder %v2137_v9, 110  ;;  %v1879_v55 = vld [vmem:[%s2420_s1 + $0x38] sm:$0xf] }
   0x6   :  { %960 = vrot.lane.b32.xlu1 %v2095_v3, %s2050_s16  ;;  %24 = vrot.lane.b32.xlu0 %v2099_v4, %s2050_s16  ;;  %v954_v34 = vld [vmem:[%s2420_s1 + $0x8] sm:$0xf]  ;;  %v1932_v56 = vld [vmem:[%s2420_s1 + $0x38] sm:$0xf]  ;;  %vm628_vm7 = vcmp.lt.s32.totalorder %v2137_v9, 96  ;;  %vm731_vm8 = vcmp.lt.s32.totalorder %v2137_v9, 95 }
   0x7   :  { %v1873_v44 = vld [vmem:[%s2420_s1 + $0x28] sm:$0xf]  ;;  %v1884_v60 = vld [vmem:[%s2420_s1 + $0x40] sm:$0xff]  ;;  %v1890_v8 = vld [vmem:[%s2420_s1 + $0x50] sm:$0xff]  ;;  %vm834_vm9 = vcmp.lt.s32.totalorder %v2137_v9, 94 }
   0x8   :  { %v1926_v45 = vld [vmem:[%s2420_s1 + $0x28] sm:$0xf]  ;;  %v1908_v9 = vld [vmem:[%s2420_s1 + $0x80] sm:$0xff] }
   0xa   :  { %214 = vrot.lane.b32.xlu1 %v2099_v4, %s2051_s0  ;;  %212 = vrot.lane.b32.xlu0 %v2087_v1, %s2051_s0 }
   0xe   :  { %1144 = vrot.lane.b32.xlu1 %v2095_v3, %s2051_s0  ;;  %1142 = vrot.lane.b32.xlu0 %v2082_v0, %s2051_s0 }
  0x12   :  { %317 = vrot.lane.b32.xlu1 %v2099_v4, %s2052_s17  ;;  %315 = vrot.lane.b32.xlu0 %v2087_v1, %s2052_s17 }
  0x16   :  { %1245 = vrot.lane.b32.xlu1 %v2095_v3, %s2052_s17  ;;  %1243 = vrot.lane.b32.xlu0 %v2082_v0, %s2052_s17 }
  0x1a   :  { %420 = vrot.lane.b32.xlu1 %v2099_v4, %s2053_s18  ;;  %418 = vrot.lane.b32.xlu0 %v2087_v1, %s2053_s18 }
  0x1e   :  { %1346 = vrot.lane.b32.xlu1 %v2095_v3, %s2053_s18  ;;  %1344 = vrot.lane.b32.xlu0 %v2082_v0, %s2053_s18 }
  0x22   :  { %523 = vrot.lane.b32.xlu1 %v2099_v4, %s2054_s19  ;;  %521 = vrot.lane.b32.xlu0 %v2087_v1, %s2054_s19 }
  0x26   :  { %1447 = vrot.lane.b32.xlu1 %v2095_v3, %s2054_s19  ;;  %1445 = vrot.lane.b32.xlu0 %v2082_v0, %s2054_s19 }
  0x2a   :  { %626 = vrot.lane.b32.xlu1 %v2099_v4, %s2055_s20  ;;  %624 = vrot.lane.b32.xlu0 %v2087_v1, %s2055_s20 }
  0x2e   :  { %1548 = vrot.lane.b32.xlu1 %v2095_v3, %s2055_s20  ;;  %1546 = vrot.lane.b32.xlu0 %v2082_v0, %s2055_s20 }
  0x32   :  { %729 = vrot.lane.b32.xlu1 %v2099_v4, %s2056_s21  ;;  %727 = vrot.lane.b32.xlu0 %v2087_v1, %s2056_s21 }
  0x36   :  { %1649 = vrot.lane.b32.xlu1 %v2095_v3, %s2056_s21  ;;  %1647 = vrot.lane.b32.xlu0 %v2082_v0, %s2056_s21 }
  0x3a   :  { %832 = vrot.lane.b32.xlu1 %v2099_v4, %s2057_s22  ;;  %830 = vrot.lane.b32.xlu0 %v2087_v1, %s2057_s22 }
  0x3e   :  { %1750 = vrot.lane.b32.xlu1 %v2095_v3, %s2057_s22  ;;  %1748 = vrot.lane.b32.xlu0 %v2082_v0, %s2057_s22 }
  0x42   :  { %935 = vperm.xlu0 %2045, %v14_v6   ;;  %940 = vperm.xlu1 %2046, %v15_v7  }
  0x74   :  { %v959_v10 = vpop.permute.xlu1 %958  ;;  %v23_v11 = vpop.permute.xlu0 %22 }
  0x78   :  { %v961_v12 = vpop.permute.xlu1 %960  ;;  %v25_v13 = vpop.permute.xlu0 %24 }
  0x79   :  { %v30_v14 = vsel %vm28_vm0, %v25_v13, %v23_v11  ;;  %v963_v15 = vsel %vm28_vm0, %v961_v12, %v959_v10  ;;  %v29_v16 = vsel %vm28_vm0, %v23_v11, %v25_v13  ;;  %v962_v17 = vsel %vm28_vm0, %v959_v10, %v961_v12 }
  0x7a   :  { %1864 = vmatprep.subr.msk.mxu0 %vm41_vm1, %v30_v14  ;;  %1917 = vmatprep.subr.msk.mxu1 %vm41_vm1, %v963_v15  ;;  %v1891_v15 = vld [vmem:[%s2420_s1 + $0x58] sm:$0xf] }
  0x7b   :  { %1865 = vmatpush1.msk.msra.mxu0 %vm41_vm1, %v29_v16  ;;  %1918 = vmatpush1.msk.msra.mxu1 %vm41_vm1, %v962_v17  ;;  %v1944_v16 = vld [vmem:[%s2420_s1 + $0x58] sm:$0xf] }
  0x7c   :  { %1866 = vmatmul.mubr.msk.f32.vlgmr.msra.gmra.mrb[0].mxu0 %vm34_vm2, %v1862_v18  ;;  %1868 = vmatprep.subr.msk.mxu0 %vm41_vm1, %v2099_v4  ;;  %v215_v19 = vpop.permute.xlu1 %214  ;;  %v213_v20 = vpop.permute.xlu0 %212  ;;  %v1938_v4 = vld [vmem:[%s2420_s1 + $0x48] sm:$0xf] }
  0x7d   :  { %1919 = vmatmul.mubr.msk.f32.vlgmr.msra.gmra.mrb[0].mxu1 %vm34_vm2, %v1862_v18  ;;  %1921 = vmatprep.subr.msk.mxu1 %vm41_vm1, %v2095_v3  ;;  %v218_v21 = vsel %vm216_vm3, %v215_v19, %v213_v20  ;;  %v217_v28 = vsel %vm216_vm3, %v213_v20, %v215_v19  ;;  %v1885_v3 = vld [vmem:[%s2420_s1 + $0x48] sm:$0xf]  ;;  %v1896_v20 = vld [vmem:[%s2420_s1 + $0x60] sm:$0xff] }
  0x7e   :  { %1922 = vmatpush1.msk.msra.mxu1 %vm41_vm1, %v2082_v0  ;;  %1869 = vmatpush1.msk.msra.mxu0 %vm41_vm1, %v2087_v1 }
  0x7f   :  { %118 = vmatprep.mubr.f32.mxu0 %v2049_v2  ;;  %1048 = vmatprep.mubr.f32.mxu1 %v2049_v2 }
  0x80   :  { %1867 = vmatmul.mubr.msk.f32.gmra.mrb[2].mxu0 %vm34_vm2, %v1863_v22  ;;  %1874 = vmatprep.subr.msk.mxu0 %vm41_vm1, %v218_v21  ;;  %v1145_v24 = vpop.permute.xlu1 %1144  ;;  %v1143_v25 = vpop.permute.xlu0 %1142 }
  0x81   :  { %1920 = vmatmul.mubr.msk.f32.gmra.mrb[2].mxu1 %vm34_vm2, %v1916_v23  ;;  %v1147_v26 = vsel %vm216_vm3, %v1145_v24, %v1143_v25  ;;  %199 = vmatprep.mubr.f32.mxu0 %v2049_v2  ;;  %v1146_v29 = vsel %vm216_vm3, %v1143_v25, %v1145_v24 }
  0x82   :  { %1129 = vmatprep.mubr.f32.mxu1 %v2049_v2  ;;  %1927 = vmatprep.subr.msk.mxu1 %vm41_vm1, %v1147_v26  ;;  %v1897_v26 = vld [vmem:[%s2420_s1 + $0x68] sm:$0xf] }
  0x84   :  { %1870 = vmatmul.mubr.msk.f32.vlgmr.msra.gmra.mrb[0].mxu0 %vm34_vm2, %v17_v27  ;;  %v318_v30 = vpop.permute.xlu1 %317  ;;  %v316_v31 = vpop.permute.xlu0 %315 }
  0x85   :  { %1875 = vmatpush1.msk.msra.mxu0 %vm41_vm1, %v217_v28  ;;  %1923 = vmatmul.mubr.msk.f32.vlgmr.msra.gmra.mrb[0].mxu1 %vm34_vm2, %v17_v27  ;;  %v321_v32 = vsel %vm319_vm4, %v318_v30, %v316_v31  ;;  %v320_v39 = vsel %vm319_vm4, %v316_v31, %v318_v30  ;;  %v1950_v27 = vld [vmem:[%s2420_s1 + $0x68] sm:$0xf]  ;;  %v1902_v31 = vld [vmem:[%s2420_s1 + $0x70] sm:$0xff] }
  0x86   :  { %1928 = vmatpush1.msk.msra.mxu1 %vm41_vm1, %v1146_v29  ;;  %205 = vmatprep.mubr.f32.mxu0 %v2049_v2 }
  0x87   :  { %1135 = vmatprep.mubr.f32.mxu1 %v2049_v2  ;;  %1880 = vmatprep.subr.msk.mxu0 %vm41_vm1, %v321_v32 }
  0x88   :  { %1871 = vmatmul.mubr.msk.f32.gmra.mrb[2].mxu0 %vm34_vm2, %v18_v33  ;;  %v1246_v35 = vpop.permute.xlu1 %1245  ;;  %v1244_v36 = vpop.permute.xlu0 %1243 }
  0x89   :  { %1924 = vmatmul.mubr.msk.f32.gmra.mrb[2].mxu1 %vm34_vm2, %v954_v34  ;;  %v1248_v37 = vsel %vm319_vm4, %v1246_v35, %v1244_v36  ;;  %298 = vmatprep.mubr.f32.mxu0 %v2049_v2  ;;  %v1247_v40 = vsel %vm319_vm4, %v1244_v36, %v1246_v35  ;;  %v1903_v34 = vld [vmem:[%s2420_s1 + $0x78] sm:$0xf]  ;;  %v1909_v36 = vld [vmem:[%s2420_s1 + $0x88] sm:$0xf] }
  0x8a   :  { %1226 = vmatprep.mubr.f32.mxu1 %v2049_v2  ;;  %1933 = vmatprep.subr.msk.mxu1 %vm41_vm1, %v1248_v37  ;;  %v1956_v35 = vld [vmem:[%s2420_s1 + $0x78] sm:$0xf]  ;;  %v1962_v37 = vld [vmem:[%s2420_s1 + $0x88] sm:$0xf] }
  0x8c   :  { %1876 = vmatmul.mubr.msk.f32.vlgmr.msra.gmra.mrb[0].mxu0 %vm34_vm2, %v1872_v38  ;;  %v421_v41 = vpop.permute.xlu1 %420  ;;  %v419_v42 = vpop.permute.xlu0 %418 }
  0x8d   :  { %1881 = vmatpush1.msk.msra.mxu0 %vm41_vm1, %v320_v39  ;;  %1929 = vmatmul.mubr.msk.f32.vlgmr.msra.gmra.mrb[0].mxu1 %vm34_vm2, %v1872_v38  ;;  %v424_v43 = vsel %vm422_vm5, %v421_v41, %v419_v42  ;;  %v423_v50 = vsel %vm422_vm5, %v419_v42, %v421_v41 }
  0x8e   :  { %1934 = vmatpush1.msk.msra.mxu1 %vm41_vm1, %v1247_v40  ;;  %304 = vmatprep.mubr.f32.mxu0 %v2049_v2 }
  0x8f   :  { %1232 = vmatprep.mubr.f32.mxu1 %v2049_v2  ;;  %1886 = vmatprep.subr.msk.mxu0 %vm41_vm1, %v424_v43 }
  0x90   :  { %1877 = vmatmul.mubr.msk.f32.gmra.mrb[2].mxu0 %vm34_vm2, %v1873_v44  ;;  %v1347_v46 = vpop.permute.xlu1 %1346  ;;  %v1345_v47 = vpop.permute.xlu0 %1344 }
  0x91   :  { %1930 = vmatmul.mubr.msk.f32.gmra.mrb[2].mxu1 %vm34_vm2, %v1926_v45  ;;  %v1349_v48 = vsel %vm422_vm5, %v1347_v46, %v1345_v47  ;;  %401 = vmatprep.mubr.f32.mxu0 %v2049_v2  ;;  %v1348_v51 = vsel %vm422_vm5, %v1345_v47, %v1347_v46 }
  0x92   :  { %1327 = vmatprep.mubr.f32.mxu1 %v2049_v2  ;;  %1939 = vmatprep.subr.msk.mxu1 %vm41_vm1, %v1349_v48 }
  0x94   :  { %1882 = vmatmul.mubr.msk.f32.vlgmr.msra.gmra.mrb[0].mxu0 %vm34_vm2, %v1878_v49  ;;  %v524_v52 = vpop.permute.xlu1 %523  ;;  %v522_v53 = vpop.permute.xlu0 %521 }
  0x95   :  { %1887 = vmatpush1.msk.msra.mxu0 %vm41_vm1, %v423_v50  ;;  %1935 = vmatmul.mubr.msk.f32.vlgmr.msra.gmra.mrb[0].mxu1 %vm34_vm2, %v1878_v49  ;;  %v527_v54 = vsel %vm525_vm6, %v524_v52, %v522_v53  ;;  %v526_v61 = vsel %vm525_vm6, %v522_v53, %v524_v52 }
  0x96   :  { %1940 = vmatpush1.msk.msra.mxu1 %vm41_vm1, %v1348_v51  ;;  %407 = vmatprep.mubr.f32.mxu0 %v2049_v2 }
  0x97   :  { %1333 = vmatprep.mubr.f32.mxu1 %v2049_v2  ;;  %1892 = vmatprep.subr.msk.mxu0 %vm41_vm1, %v527_v54 }
  0x98   :  { %1883 = vmatmul.mubr.msk.f32.gmra.mrb[2].mxu0 %vm34_vm2, %v1879_v55  ;;  %v1448_v57 = vpop.permute.xlu1 %1447  ;;  %v1446_v58 = vpop.permute.xlu0 %1445 }
  0x99   :  { %1936 = vmatmul.mubr.msk.f32.gmra.mrb[2].mxu1 %vm34_vm2, %v1932_v56  ;;  %v1450_v59 = vsel %vm525_vm6, %v1448_v57, %v1446_v58  ;;  %504 = vmatprep.mubr.f32.mxu0 %v2049_v2  ;;  %v1449_v62 = vsel %vm525_vm6, %v1446_v58, %v1448_v57 }
  0x9a   :  { %1428 = vmatprep.mubr.f32.mxu1 %v2049_v2  ;;  %1945 = vmatprep.subr.msk.mxu1 %vm41_vm1, %v1450_v59 }
  0x9c   :  { %1888 = vmatmul.mubr.msk.f32.vlgmr.msra.gmra.mrb[0].mxu0 %vm34_vm2, %v1884_v60  ;;  %v627_v63 = vpop.permute.xlu1 %626  ;;  %v625_v0 = vpop.permute.xlu0 %624 }
  0x9d   :  { %1893 = vmatpush1.msk.msra.mxu0 %vm41_vm1, %v526_v61  ;;  %1941 = vmatmul.mubr.msk.f32.vlgmr.msra.gmra.mrb[0].mxu1 %vm34_vm2, %v1884_v60  ;;  %v630_v1 = vsel %vm628_vm7, %v627_v63, %v625_v0  ;;  %v629_v10 = vsel %vm628_vm7, %v625_v0, %v627_v63 }
  0x9e   :  { %1946 = vmatpush1.msk.msra.mxu1 %vm41_vm1, %v1449_v62  ;;  %510 = vmatprep.mubr.f32.mxu0 %v2049_v2 }
  0x9f   :  { %1434 = vmatprep.mubr.f32.mxu1 %v2049_v2  ;;  %1898 = vmatprep.subr.msk.mxu0 %vm41_vm1, %v630_v1 }
  0xa0   :  { %1889 = vmatmul.mubr.msk.f32.gmra.mrb[2].mxu0 %vm34_vm2, %v1885_v3  ;;  %v1549_v5 = vpop.permute.xlu1 %1548  ;;  %v1547_v6 = vpop.permute.xlu0 %1546 }
  0xa1   :  { %1942 = vmatmul.mubr.msk.f32.gmra.mrb[2].mxu1 %vm34_vm2, %v1938_v4  ;;  %v1551_v7 = vsel %vm628_vm7, %v1549_v5, %v1547_v6  ;;  %607 = vmatprep.mubr.f32.mxu0 %v2049_v2  ;;  %v1550_v11 = vsel %vm628_vm7, %v1547_v6, %v1549_v5 }
  0xa2   :  { %1529 = vmatprep.mubr.f32.mxu1 %v2049_v2  ;;  %1951 = vmatprep.subr.msk.mxu1 %vm41_vm1, %v1551_v7 }
  0xa4   :  { %1894 = vmatmul.mubr.msk.f32.vlgmr.msra.gmra.mrb[0].mxu0 %vm34_vm2, %v1890_v8  ;;  %v730_v12 = vpop.permute.xlu1 %729  ;;  %v728_v13 = vpop.permute.xlu0 %727 }
  0xa5   :  { %1899 = vmatpush1.msk.msra.mxu0 %vm41_vm1, %v629_v10  ;;  %1947 = vmatmul.mubr.msk.f32.vlgmr.msra.gmra.mrb[0].mxu1 %vm34_vm2, %v1890_v8  ;;  %v733_v14 = vsel %vm731_vm8, %v730_v12, %v728_v13  ;;  %v732_v21 = vsel %vm731_vm8, %v728_v13, %v730_v12 }
  0xa6   :  { %1952 = vmatpush1.msk.msra.mxu1 %vm41_vm1, %v1550_v11  ;;  %613 = vmatprep.mubr.f32.mxu0 %v2049_v2 }
  0xa7   :  { %1535 = vmatprep.mubr.f32.mxu1 %v2049_v2  ;;  %1904 = vmatprep.subr.msk.mxu0 %vm41_vm1, %v733_v14 }
  0xa8   :  { %1895 = vmatmul.mubr.msk.f32.gmra.mrb[2].mxu0 %vm34_vm2, %v1891_v15  ;;  %v1650_v17 = vpop.permute.xlu1 %1649  ;;  %v1648_v18 = vpop.permute.xlu0 %1647 }
  0xa9   :  { %1948 = vmatmul.mubr.msk.f32.gmra.mrb[2].mxu1 %vm34_vm2, %v1944_v16  ;;  %v1652_v19 = vsel %vm731_vm8, %v1650_v17, %v1648_v18  ;;  %710 = vmatprep.mubr.f32.mxu0 %v2049_v2  ;;  %v1651_v22 = vsel %vm731_vm8, %v1648_v18, %v1650_v17 }
  0xaa   :  { %1630 = vmatprep.mubr.f32.mxu1 %v2049_v2  ;;  %1957 = vmatprep.subr.msk.mxu1 %vm41_vm1, %v1652_v19 }
  0xac   :  { %1900 = vmatmul.mubr.msk.f32.vlgmr.msra.gmra.mrb[0].mxu0 %vm34_vm2, %v1896_v20  ;;  %v833_v23 = vpop.permute.xlu1 %832  ;;  %v831_v24 = vpop.permute.xlu0 %830 }
  0xad   :  { %1905 = vmatpush1.msk.msra.mxu0 %vm41_vm1, %v732_v21  ;;  %1953 = vmatmul.mubr.msk.f32.vlgmr.msra.gmra.mrb[0].mxu1 %vm34_vm2, %v1896_v20  ;;  %v836_v25 = vsel %vm834_vm9, %v833_v23, %v831_v24  ;;  %v835_v32 = vsel %vm834_vm9, %v831_v24, %v833_v23 }
  0xae   :  { %1958 = vmatpush1.msk.msra.mxu1 %vm41_vm1, %v1651_v22  ;;  %716 = vmatprep.mubr.f32.mxu0 %v2049_v2 }
  0xaf   :  { %1636 = vmatprep.mubr.f32.mxu1 %v2049_v2  ;;  %1910 = vmatprep.subr.msk.mxu0 %vm41_vm1, %v836_v25 }
  0xb0   :  { %1901 = vmatmul.mubr.msk.f32.gmra.mrb[2].mxu0 %vm34_vm2, %v1897_v26  ;;  %v1751_v28 = vpop.permute.xlu1 %1750  ;;  %v1749_v29 = vpop.permute.xlu0 %1748 }
  0xb1   :  { %1954 = vmatmul.mubr.msk.f32.gmra.mrb[2].mxu1 %vm34_vm2, %v1950_v27  ;;  %v1753_v30 = vsel %vm834_vm9, %v1751_v28, %v1749_v29  ;;  %813 = vmatprep.mubr.f32.mxu0 %v2049_v2  ;;  %v1752_v33 = vsel %vm834_vm9, %v1749_v29, %v1751_v28 }
  0xb2   :  { %1731 = vmatprep.mubr.f32.mxu1 %v2049_v2  ;;  %1963 = vmatprep.subr.msk.mxu1 %vm41_vm1, %v1753_v30 }
  0xb4   :  { %1906 = vmatmul.mubr.msk.f32.vlgmr.msra.gmra.mrb[0].mxu0 %vm34_vm2, %v1902_v31 }
  0xb5   :  { %1911 = vmatpush1.msk.msra.mxu0 %vm41_vm1, %v835_v32  ;;  %1959 = vmatmul.mubr.msk.f32.vlgmr.msra.gmra.mrb[0].mxu1 %vm34_vm2, %v1902_v31 }
  0xb6   :  { %1964 = vmatpush1.msk.msra.mxu1 %vm41_vm1, %v1752_v33  ;;  %819 = vmatprep.mubr.f32.mxu0 %v2049_v2 }
  0xb7   :  { %1737 = vmatprep.mubr.f32.mxu1 %v2049_v2 }
  0xb8   :  { %1907 = vmatmul.mubr.msk.f32.gmra.mrb[2].mxu0 %vm34_vm2, %v1903_v34 }
  0xb9   :  { %1960 = vmatmul.mubr.msk.f32.gmra.mrb[2].mxu1 %vm34_vm2, %v1956_v35  ;;  %916 = vmatprep.mubr.f32.mxu0 %v2049_v2 }
  0xba   :  { %1832 = vmatprep.mubr.f32.mxu1 %v2049_v2 }
  0xbc   :  { %1912 = vmatmul.mubr.msk.f32.vlgmr.msra.gmra.mrb[0].mxu0 %vm34_vm2, %v1908_v9 }
  0xbd   :  { %1965 = vmatmul.mubr.msk.f32.vlgmr.msra.gmra.mrb[0].mxu1 %vm34_vm2, %v1908_v9  ;;  %922 = vmatprep.mubr.f32.mxu0 %v2049_v2 }
  0xbe   :  { %1838 = vmatprep.mubr.f32.mxu1 %v2049_v2 }
  0xc0   :  { %1913 = vmatmul.mubr.msk.f32.gmra.mrb[2].mxu0 %vm34_vm2, %v1909_v36 }
  0xc1   :  { %1966 = vmatmul.mubr.msk.f32.gmra.mrb[2].mxu1 %vm34_vm2, %v1962_v37  ;;  %v936_v38 = vpop.permute.xlu0 %935  ;;  %v941_v46 = vpop.permute.xlu1 %940 }
 0x18f   :  { %v918_v39 = vpop.f32.mrb[0].mxu0 }
 0x190   :  { %v1834_v40 = vpop.f32.mrb[0].mxu1  ;;  %v943_v41 = vadd.f32 %v936_v38, %v918_v39  ;;  %v920_v42 = vpop.f32.mrb[1].mxu0 }
 0x191   :  { %v1849_v43 = vadd.f32 %v1834_v40, %v936_v38  ;;  %v944_v44 = vadd.f32 %v936_v38, %v920_v42  ;;  %v1836_v45 = vpop.f32.mrb[1].mxu1 }
 0x192   :  { %947 = vst [vmem:[%s2421_s3] sm:$0xff] %v943_v41  ;;  %v1850_v2 = vadd.f32 %v1836_v45, %v936_v38 }
 0x193   :  { %1967 = vst [vmem:[%s2421_s3 + $0x20] sm:$0xff] %v1849_v43  ;;  %948 = vst [vmem:[%s2421_s3 + $0x8] sm:$0xff] %v944_v44  ;;  %v924_v47 = vpop.f32.mrb[2].mxu0 }
 0x194   :  { %1968 = vst [vmem:[%s2421_s3 + $0x28] sm:$0xff] %v1850_v2  ;;  %v945_v48 = vadd.f32 %v941_v46, %v924_v47  ;;  %v1840_v49 = vpop.f32.mrb[2].mxu1  ;;  %v926_v50 = vpop.f32.mrb[3].mxu0 }
 0x195   :  { %v1851_v51 = vadd.f32 %v1840_v49, %v941_v46  ;;  %v946_v52 = vadd.f32 %v941_v46, %v926_v50  ;;  %v1842_v53 = vpop.f32.mrb[3].mxu1 }
 0x196   :  { %949 = vst [vmem:[%s2421_s3 + $0x10] sm:$0xf] %v945_v48  ;;  %v1852_v54 = vadd.f32 %v1842_v53, %v941_v46 }
 0x197   :  { %1969 = vst [vmem:[%s2421_s3 + $0x30] sm:$0xf] %v1851_v51  ;;  %950 = vst [vmem:[%s2421_s3 + $0x18] sm:$0xf] %v946_v52 }
 0x198   :  { %1970 = vst [vmem:[%s2421_s3 + $0x38] sm:$0xf] %v1852_v54 }

</bundles_post_ra>
